<compile_context>
chip_gen: v5e
topology: v5e:2x2
jax: 0.10.0
libtpu: 0.0.40
codegen_flags: <defaults>
</compile_context>

<pallas_src>
import functools
import math

import jax
import jax.numpy as jnp
from jax import lax
from jax.experimental import pallas as pl
from jax.experimental.pallas import tpu as pltpu

_LANE = 128


def _round_up(x, m):
    return ((x + m - 1) // m) * m


def _vmem_capacity_bytes():
    """Physical VMEM per TensorCore (128 MiB v5e/v6e, 64 MiB v7x); conservative fallback."""
    try:
        info = pltpu.get_tpu_info()
        for name in ("vmem_capacity_bytes", "vmem_size_bytes", "vmem_bytes"):
            v = getattr(info, name, None)
            if v:
                return int(v)
    except Exception:
        pass
    return 64 << 20


def _vmem_limit(needed_bytes, cap):
    """Scoped-VMEM request: per-step working set + slack, >=8 MiB left for Mosaic scratch."""
    return int(min(max(int(needed_bytes) + (4 << 20), 16 << 20), cap - (8 << 20)))


def _pick_tile_lanes(C, HW, dtype_bytes, budget_bytes):
    """Spatial tile (lanes) so that C*tile*dtype ~= budget; full row if it fits."""
    per_lane = max(C * dtype_bytes, 1)
    if HW * per_lane <= budget_bytes:
        return int(HW)                      # block == full dim (exempt from /128 rule)
    return int(max(_LANE, (budget_bytes // per_lane) // _LANE * _LANE))


def _sanitize_tile(t, HW):
    t = int(t)
    if t >= HW:
        return int(HW)                      # full-row block, no masking needed
    return max(_LANE, (t // _LANE) * _LANE)


def _channel_conv3(m, w_ref):
    """Zero-padded k=3 1-D conv along the last (channel) axis of m: (bb, C) f32."""
    C = m.shape[-1]
    if C == 1:
        return w_ref[1] * m
    ax = m.ndim - 1
    idx = lax.broadcasted_iota(jnp.int32, m.shape, dimension=ax)
    # pltpu.roll needs non-negative shifts; cyclic shift by C-1 == shift by -1.
    m_prev = jnp.where(idx >= 1, pltpu.roll(m, shift=1, axis=ax), 0.0)          # m[c-1]
    m_next = jnp.where(idx <= C - 2, pltpu.roll(m, shift=C - 1, axis=ax), 0.0)  # m[c+1]
    return w_ref[0] * m_prev + w_ref[1] * m + w_ref[2] * m_next


# ---------------------------------------------------------------------------
# Path A: fused single-pass kernel, grid over batch blocks only.
# ---------------------------------------------------------------------------
def _ca_fused_kernel(hw_true, w_ref, x_ref, o_ref):
    # w_ref : SMEM (3,) f32 conv taps
    # x_ref : VMEM (bb, C, HW) input block; o_ref same shape.  Last dim == full HW,
    # so there is no lane padding and the sum/mean is exact.  f32 only for the mean.
    s = jnp.sum(x_ref[...], axis=-1, dtype=jnp.float32)          # (bb, C)
    m = s * (1.0 / float(hw_true))
    attn = jax.nn.sigmoid(_channel_conv3(m, w_ref))               # (bb, C) f32
    a = attn.astype(x_ref.dtype)[:, :, None]                      # gate in input dtype
    o_ref[...] = (x_ref[...] * a).astype(o_ref.dtype)


# ---------------------------------------------------------------------------
# Path B: tiled two-pass kernels.
#   pass 1: masked partial channel sums, grid = (B, split, n_sub)
#   (gate math - mean, k=3 conv, sigmoid - is O(B*C) and done in plain jnp)
#   pass 2: apply gate, grid = (B, n_tiles)
# ---------------------------------------------------------------------------
def _ca_partial_kernel(hw_true, tile, n_sub, need_mask, x_ref, part_ref, acc_ref):
    s = pl.program_id(1)
    t = pl.program_id(2)

    @pl.when(t == 0)
    def _init():
        acc_ref[...] = jnp.zeros_like(acc_ref)

    x = x_ref[...]                                                # (1, C, tile)
    if need_mask:
        # Ragged last tile: OOB lanes read garbage -> zero them before reducing.
        lane = lax.broadcasted_iota(jnp.int32, x.shape, dimension=2)
        start = (s * n_sub + t) * tile
        x = jnp.where(start + lane < hw_true, x, jnp.zeros_like(x))

    # NOTE: jnp.sum over lanes (XLU) per tile is hidden under DMA on v5e/v6e;
    # a chunked-VPU accumulator is a possible v7x follow-up.
    acc_ref[...] += jnp.sum(x, axis=-1, dtype=jnp.float32)        # (1, C)

    @pl.when(t == n_sub - 1)
    def _finalize():
        part_ref[...] = acc_ref[...].reshape(1, 1, 1, acc_ref.shape[-1])


def _ca_apply_kernel(attn_ref, x_ref, o_ref):
    # Gate one spatial tile; ragged-tail writes past HW are dropped by Pallas.
    a = attn_ref[...].astype(x_ref.dtype)                         # (1, C, 1)
    o_ref[...] = (x_ref[...] * a).astype(o_ref.dtype)


# ---------------------------------------------------------------------------
# Wrapper
# ---------------------------------------------------------------------------
def channel_attention(x_nchw, conv_w, *, force_tiled=False,
                      batch_block=None, reduce_tile=None, apply_tile=None):
    """x_nchw: (B, C, H, W); conv_w: Conv1d(1,1,3,bias=False) weight (any shape, 3 taps).

    batch_block / reduce_tile / apply_tile are tuning/test overrides.
    """
    B, C, H, W = x_nchw.shape
    HW = H * W
    w = jnp.asarray(conv_w, jnp.float32).reshape(-1)
    assert w.shape == (3,), "conv weight must have exactly 3 taps"
    dtype_bytes = jnp.dtype(x_nchw.dtype).itemsize

    x = x_nchw.reshape(B, C, HW)                                  # free (contiguous)

    cap = _vmem_capacity_bytes()
    usable = max(cap - (16 << 20), 32 << 20)                      # headroom for Mosaic

    # ---- path selection -----------------------------------------------------
    elem_bytes = C * HW * dtype_bytes                             # one batch element
    max_block_bytes = usable // 4                                 # in+out, double-buffered
    use_single = (not force_tiled) and (elem_bytes <= max_block_bytes)

    if use_single:
        if batch_block is not None:
            bb = max(1, min(int(batch_block), B))
        else:
            target = min(8 << 20, max_block_bytes)                # ~8 MiB blocks
            bb = max(1, min(B, target // max(elem_bytes, 1)))
        bb = max(1, min(bb, max_block_bytes // max(elem_bytes, 1)))
        block_bytes = bb * elem_bytes

        out = pl.pallas_call(
            functools.partial(_ca_fused_kernel, HW),
            out_shape=jax.ShapeDtypeStruct((B, C, HW), x.dtype),
            grid_spec=pltpu.PrefetchScalarGridSpec(
                num_scalar_prefetch=0,
                grid=(pl.cdiv(B, bb),),
                in_specs=[
                    pl.BlockSpec(memory_space=pltpu.MemorySpace.SMEM),   # conv taps
                    pl.BlockSpec((bb, C, HW), lambda i: (i, 0, 0)),      # x batch block
                ],
                out_specs=pl.BlockSpec((bb, C, HW), lambda i: (i, 0, 0)),
            ),
            compiler_params=pltpu.CompilerParams(
                dimension_semantics=("parallel",),
                vmem_limit_bytes=_vmem_limit(4 * block_bytes, cap),
            ),
        )(w, x)
        return out.reshape(B, C, H, W)

    # ---- tiled two-pass path --------------------------------------------------
    # Reduce tile ~2x apply tile: pass 1 only double-buffers its input.
    tile_r = _sanitize_tile(
        reduce_tile if reduce_tile else
        _pick_tile_lanes(C, HW, dtype_bytes, min(16 << 20, usable // 3)), HW)
    tile_a = _sanitize_tile(
        apply_tile if apply_tile else
        _pick_tile_lanes(C, HW, dtype_bytes, min(8 << 20, usable // 6)), HW)

    n_red = pl.cdiv(HW, tile_r)
    # B==1: split the spatial-tile axis 2-way so both v7x TensorCores run pass 1.
    split = 2 if (B == 1 and n_red >= 4 and n_red % 2 == 0) else 1
    n_sub = n_red // split
    need_mask = (HW % tile_r) != 0
    tile_r_bytes = C * tile_r * dtype_bytes

    part = pl.pallas_call(
        functools.partial(_ca_partial_kernel, HW, tile_r, n_sub, need_mask),
        out_shape=jax.ShapeDtypeStruct((B, split, 1, C), jnp.float32),
        grid_spec=pltpu.PrefetchScalarGridSpec(
            num_scalar_prefetch=0,
            grid=(B, split, n_sub),
            in_specs=[
                pl.BlockSpec((1, C, tile_r), lambda b, s, t: (b, 0, s * n_sub + t)),
            ],
            out_specs=pl.BlockSpec((1, 1, 1, C), lambda b, s, t: (b, s, 0, 0)),
            scratch_shapes=[pltpu.VMEM((1, C), jnp.float32)],
        ),
        compiler_params=pltpu.CompilerParams(
            dimension_semantics=("parallel", "parallel", "arbitrary"),
            vmem_limit_bytes=_vmem_limit(2 * tile_r_bytes + 8 * C * 4, cap),
        ),
    )(x)

    # Tiny O(B*C) gate math (mean -> zero-padded k=3 conv along C -> sigmoid) in jnp.
    m = jnp.sum(part, axis=(1, 2)) * (1.0 / float(HW))            # (B, C) f32
    mp = jnp.pad(m, ((0, 0), (1, 1)))
    y = w[0] * mp[:, :-2] + w[1] * mp[:, 1:-1] + w[2] * mp[:, 2:]
    attn = jax.nn.sigmoid(y)[:, :, None]                          # (B, C, 1) f32

    n_app = pl.cdiv(HW, tile_a)
    tile_a_bytes = C * tile_a * dtype_bytes
    out = pl.pallas_call(
        _ca_apply_kernel,
        out_shape=jax.ShapeDtypeStruct((B, C, HW), x.dtype),
        grid_spec=pltpu.PrefetchScalarGridSpec(
            num_scalar_prefetch=0,
            grid=(B, n_app),
            in_specs=[
                pl.BlockSpec((1, C, 1), lambda b, t: (b, 0, 0)),            # gate
                pl.BlockSpec((1, C, tile_a), lambda b, t: (b, 0, t)),       # x tile
            ],
            out_specs=pl.BlockSpec((1, C, tile_a), lambda b, t: (b, 0, t)),
        ),
        compiler_params=pltpu.CompilerParams(
            dimension_semantics=("parallel", "parallel"),
            vmem_limit_bytes=_vmem_limit(4 * tile_a_bytes + 4 * C * 4, cap),
        ),
    )(attn, x)
    return out.reshape(B, C, H, W)


# ---------------------------------------------------------------------------
# Pure-JAX reference replicating the PyTorch semantics.
# ---------------------------------------------------------------------------
def _reference(x_nchw, conv_w):
    w = jnp.asarray(conv_w, jnp.float32).reshape(-1)
    m = jnp.mean(x_nchw.astype(jnp.float32), axis=(2, 3))        # (B, C)
    mp = jnp.pad(m, ((0, 0), (1, 1)))                            # zero pad along C
    y = w[0] * mp[:, :-2] + w[1] * mp[:, 1:-1] + w[2] * mp[:, 2:]
    attn = jax.nn.sigmoid(y)[:, :, None, None]                   # (B, C, 1, 1)
    return (x_nchw * attn.astype(x_nchw.dtype)).astype(x_nchw.dtype)


if __name__ == "__main__":
    key = jax.random.PRNGKey(0)
    kx1, kx2, kx3, kx4, kx5, kw = jax.random.split(key, 6)

    # Conv1d(1, 1, 3, bias=False) weight has shape (1, 1, 3); kaiming-uniform-like bound.
    bound = 1.0 / math.sqrt(3.0)
    conv_w = jax.random.uniform(kw, (1, 1, 3), minval=-bound, maxval=bound, dtype=jnp.float32)

    def _check(name, x, **kwargs):
        out = jax.block_until_ready(channel_attention(x, conv_w, **kwargs))
        assert out.shape == x.shape, name
        assert jnp.allclose(out, _reference(x, conv_w), atol=1e-5, rtol=1e-5), f"{name} mismatch"

    # 1) module-default small shape -> fused single-pass path (whole batch in one block)
    _check("fused", jax.random.normal(kx1, (2, 4, 16, 16), dtype=jnp.float32))

    # 2) fused path with a ragged batch block (B=3, batch block of 2)
    _check("fused-ragged-batch",
           jax.random.normal(kx2, (3, 4, 16, 16), dtype=jnp.float32), batch_block=2)

    # 3) non-128-multiple spatial size, full-row block -> no padding / slicing anywhere
    _check("fused-ragged-lanes", jax.random.normal(kx3, (1, 4, 6, 6), dtype=jnp.float32))

    # 4) tiled two-pass path (tile == full row, no masking)
    _check("tiled", jax.random.normal(kx4, (2, 8, 16, 16), dtype=jnp.float32),
           force_tiled=True)

    # 5) tiled path with ragged last tile + B==1 two-way core split of the reduce pass
    _check("tiled-ragged-split",
           jax.random.normal(kx5, (1, 8, 20, 20), dtype=jnp.float32),
           force_tiled=True, reduce_tile=128, apply_tile=128)

    print("KERNEL_OK")
</pallas_src>

<mosaic_0001>
module attributes {stable_mosaic.version = 11 : i64} {
  func.func @_ca_fused_kernel(%arg0: i32, %arg1: memref<3xf32, #tpu.memory_space<smem>>, %arg2: memref<2x4x256xf32, #tpu.memory_space<vmem>>, %arg3: memref<2x4x256xf32, #tpu.memory_space<vmem>>) attributes {dimension_semantics = [#tpu.dimension_semantics<parallel>], iteration_bounds = array<i64: 1>, scalar_prefetch = 0 : i64, scratch_operands = 0 : i64, tpu.core_type = #tpu.core_type<tc>, window_params = [{transform_indices = @transform_0, window_bounds = array<i64: 3>}, {transform_indices = @transform_1, window_bounds = array<i64: 2, 4, 256>}, {transform_indices = @transform_2, window_bounds = array<i64: 2, 4, 256>}]} {
    %c0 = arith.constant 0 : index
    %c0_0 = arith.constant 0 : index
    %c0_1 = arith.constant 0 : index
    %0 = vector.load %arg2[%c0, %c0_0, %c0_1] : memref<2x4x256xf32, #tpu.memory_space<vmem>>, vector<2x4x256xf32>
    %cst = arith.constant dense<0.000000e+00> : vector<2x4xf32>
    %1 = vector.multi_reduction <add>, %0, %cst [2] : vector<2x4x256xf32> to vector<2x4xf32>
    %cst_2 = arith.constant 3.906250e-03 : f32
    %2 = vector.broadcast %cst_2 : f32 to vector<2x4xf32>
    %3 = arith.mulf %1, %2 : vector<2x4xf32>
    %4 = tpu.iota {dimensions = array<i32: 1>} : vector<2x4xi32>
    %c1_i32 = arith.constant 1 : i32
    %5 = vector.broadcast %c1_i32 : i32 to vector<2x4xi32>
    %6 = arith.cmpi sge, %4, %5 : vector<2x4xi32>
    %c1_i32_3 = arith.constant 1 : i32
    %7 = tpu.dynamic_rotate %3 by %c1_i32_3 dim 1 : vector<2x4xf32>, i32 -> vector<2x4xf32>
    %cst_4 = arith.constant 0.000000e+00 : f32
    %8 = vector.broadcast %cst_4 : f32 to vector<2x4xf32>
    %9 = arith.select %6, %7, %8 : vector<2x4xi1>, vector<2x4xf32>
    %c2_i32 = arith.constant 2 : i32
    %10 = vector.broadcast %c2_i32 : i32 to vector<2x4xi32>
    %11 = arith.cmpi sle, %4, %10 : vector<2x4xi32>
    %c3_i32 = arith.constant 3 : i32
    %12 = tpu.dynamic_rotate %3 by %c3_i32 dim 1 : vector<2x4xf32>, i32 -> vector<2x4xf32>
    %cst_5 = arith.constant 0.000000e+00 : f32
    %13 = vector.broadcast %cst_5 : f32 to vector<2x4xf32>
    %14 = arith.select %11, %12, %13 : vector<2x4xi1>, vector<2x4xf32>
    %c0_6 = arith.constant 0 : index
    %15 = memref.load %arg1[%c0_6] : memref<3xf32, #tpu.memory_space<smem>>
    %16 = vector.broadcast %15 : f32 to vector<2x4xf32>
    %17 = arith.mulf %16, %9 : vector<2x4xf32>
    %c1 = arith.constant 1 : index
    %18 = memref.load %arg1[%c1] : memref<3xf32, #tpu.memory_space<smem>>
    %19 = vector.broadcast %18 : f32 to vector<2x4xf32>
    %20 = arith.mulf %19, %3 : vector<2x4xf32>
    %21 = arith.addf %17, %20 : vector<2x4xf32>
    %c2 = arith.constant 2 : index
    %22 = memref.load %arg1[%c2] : memref<3xf32, #tpu.memory_space<smem>>
    %23 = vector.broadcast %22 : f32 to vector<2x4xf32>
    %24 = arith.mulf %23, %14 : vector<2x4xf32>
    %25 = arith.addf %21, %24 : vector<2x4xf32>
    %26 = arith.negf %25 : vector<2x4xf32>
    %27 = math.exp %26 : vector<2x4xf32>
    %cst_7 = arith.constant 1.000000e+00 : f32
    %28 = vector.broadcast %cst_7 : f32 to vector<2x4xf32>
    %29 = arith.addf %28, %27 : vector<2x4xf32>
    %30 = arith.divf %28, %29 : vector<2x4xf32>
    %31 = vector.shape_cast %30 : vector<2x4xf32> to vector<2x4x1xf32>
    %c0_8 = arith.constant 0 : index
    %c0_9 = arith.constant 0 : index
    %c0_10 = arith.constant 0 : index
    %32 = vector.load %arg2[%c0_8, %c0_9, %c0_10] : memref<2x4x256xf32, #tpu.memory_space<vmem>>, vector<2x4x256xf32>
    %33 = vector.broadcast %31 : vector<2x4x1xf32> to vector<2x4x256xf32>
    %34 = arith.mulf %32, %33 : vector<2x4x256xf32>
    %c0_11 = arith.constant 0 : index
    %c0_12 = arith.constant 0 : index
    %c0_13 = arith.constant 0 : index
    %35 = vector.load %arg3[%c0_11, %c0_12, %c0_13] : memref<2x4x256xf32, #tpu.memory_space<vmem>>, vector<2x4x256xf32>
    tpu.vector_store %arg3[%c0_11, %c0_12, %c0_13], %34 {strides = array<i32>} : memref<2x4x256xf32, #tpu.memory_space<vmem>>, vector<2x4x256xf32>,
    return
  }
  func.func @transform_0(%arg0: i32) -> i32 {
    %c0_i32 = arith.constant 0 : i32
    %c0_i32_0 = arith.constant 0 : i32
    return %c0_i32 : i32
  }
  func.func @transform_1(%arg0: i32) -> (i32, i32, i32) {
    %c0_i32 = arith.constant 0 : i32
    %c0_i32_0 = arith.constant 0 : i32
    %c0_i32_1 = arith.constant 0 : i32
    return %arg0, %c0_i32, %c0_i32_0 : i32, i32, i32
  }
  func.func @transform_2(%arg0: i32) -> (i32, i32, i32) {
    %c0_i32 = arith.constant 0 : i32
    %c0_i32_0 = arith.constant 0 : i32
    %c0_i32_1 = arith.constant 0 : i32
    return %arg0, %c0_i32, %c0_i32_0 : i32, i32, i32
  }
}

</mosaic_0001>

<bundles_post_ra>
// kernel: tpu_custom_call.1
= control target key start
LH: loop header
LB: loop body
LE: loop exit
PB: predicated region body
PF: predicated region fallthrough
CT: control target
= control target key end

     0   :  { %7 = vsyncpa [#allocation5], 0  ;;  %s314_s0 = inlined_call_operand.hbm [shape: f32[3], index: 0, kind: input, shape index: {}]   ;;  %s315_s1 = inlined_call_operand.hbm [shape: f32[2,4,256], index: 1, kind: input, shape index: {}]   ;;  %s316_s2 = inlined_call_operand.hbm [shape: f32[2,4,256], index: 2, kind: output, shape index: {}]  }
   0x1   :  { %8 = vsyncpa [#allocation3], 0 }
   0x2   :  { %9 = vsyncpa [#allocation4], 0  ;;  %s15_s11 = sshll.u32 %s314_s0, 4  ;;  %s23_s14 = sshll.u32 %s315_s1, 4  ;;  %s16_s11 = int_to_ptr.hbm [resolvable:$true] %s15_s11  ;;  %s24_s14 = int_to_ptr.hbm [resolvable:$true] %s23_s14 }
   0x3   :  { %s267_s15 = smov [#allocation2]   ;;  %s268_s16 = smov [#allocation6]  }
   0x4   :  { %18 = dma.hbm_to_smem %s16_s11, 16, %s267_s15, [#allocation5]  }
   0x5   :  { %s25_s17 = sshll.u32 %s268_s16, 4  ;;  %s269_s18 = smov 128   ;;  %s26_s17 = int_to_ptr.vmem [resolvable:$true] %s25_s17 }
   0x6   :  { %s270_s19 = smov 8  }
   0x7   :  { %31 = dma.hbm_to_vmem [thread:$0]  %s24_s14, 256, %s26_s17, [#allocation3], %s269_s18, %s269_s18, %s270_s19  }
   0x8   :  { %261 = dma.done.wait [#allocation5], 16  }
   0x9   :  { %262 = vsyncadd [#allocation5], 4294967280 }
   0xa   :  { %263 = dma.done.wait [#allocation3], 256  }
   0xb   :  { %264 = vsyncadd [#allocation3], 4294967040 }
   0xc   :  { %40 = sfence }
   0xd   :  { %v300_v0 = vld [vmem:[#allocation6] sm:$0xff]  ;;  %v302_v1 = vld [vmem:[#allocation6 + $0x8] sm:$0xff]  ;;  %vm56_vm0 = vcmask 1043456   ;;  %s183_s0 = sld [smem:[#allocation2 + $0x1]]  ;;  %v69_v13 = vlaneseq  ;;  %vm76_vm1 = vcmask 1041409   ;;  %s271_s1 = smov 4  }
   0xe   :  { %45 = vst [vmem:[#allocation1] ss:$2 sm:$0xff] %v300_v0  ;;  %vm79_vm2 = vcmask 1047584   ;;  %s272_s20 = smov 125   ;;  %s273_s21 = smov 127  }
   0xf   :  { %49 = vst [vmem:[#allocation1 + $0x10] ss:$2 sm:$0xff] %v302_v1  ;;  %v70_v16 = vand.u32 127, %v69_v13  ;;  %v135_v31 = vshrl.u32 %v69_v13, 7  ;;  %s96_s22 = sld [smem:[#allocation2]]  ;;  %s275_s24 = smov [#allocation7]  }
  0x10   :  { %s184_s23 = sld [smem:[#allocation2 + $0x2]]  ;;  %v274_v57 = vmov 839922192   ;;  %s167_s25 = sshll.u32 %s275_s24, 4  ;;  %s168_s25 = int_to_ptr.vmem [resolvable:$true] %s167_s25 }
  0x11   :  { %196 = vset.pattern.permute.xlu1 %v135_v31  ;;  %195 = vset.pattern.permute.xlu0 %v135_v31  ;;  %vm71_vm3 = vcmp.ge.s32.totalorder %v70_v16, 1  ;;  %vm91_vm4 = vcmp.le.s32.totalorder %v70_v16, 2  ;;  %v150_v58 = vunpack.c.l.s4 %v274_v57  ;;  %s169_s28 = sshll.u32 %s316_s2, 4  ;;  %s170_s28 = int_to_ptr.hbm [resolvable:$true] %s169_s28 }
  0x13   :  { %v100_v15 = vstv %s183_s0  ;;  %v151_v59 = vunpack.c.0.s8 %v150_v58 }
  0x15   :  { %v46_v2 = vld.sshfl [vmem:[#allocation1] sm:$0xff pattern:$0x75316420]  ;;  %v47_v3 = vld.sshfl [vmem:[#allocation1 + $0x8] sm:$0xff pattern:$0x75316420]  ;;  %v97_v33 = vstv %s96_s22 }
  0x16   :  { %v57_v4 = vsel %vm56_vm0, %v46_v2, 0.0  ;;  %v58_v5 = vsel %vm56_vm0, %v47_v3, 0.0  ;;  %v50_v7 = vld.sshfl [vmem:[#allocation1 + $0x10] sm:$0xff pattern:$0x75316420]  ;;  %v111_v36 = vstv %s184_s23 }
  0x17   :  { %v59_v6 = vadd.f32 %v58_v5, %v57_v4  ;;  %v51_v8 = vld.sshfl [vmem:[#allocation1 + $0x18] sm:$0xff pattern:$0x75316420]  ;;  %v62_v9 = vsel %vm56_vm0, %v50_v7, 0.0 }
  0x18   :  { %v63_v10 = vsel %vm56_vm0, %v51_v8, 0.0 }
  0x19   :  { %60 = vadd.xlane.f32.xlu0 %v59_v6  ;;  %v64_v11 = vadd.f32 %v63_v10, %v62_v9 }
  0x21   :  { %65 = vadd.xlane.f32.xlu0 %v64_v11 }
  0x8c   :  { %v61_v12 = vpop.xlane.xlu0 %60 }
  0x8d   :  { %v67_v14 = vmul.f32 0.00390625, %v61_v12 }
  0x8f   :  { %v101_v18 = vmul.f32 %v100_v15, %v67_v14  ;;  %v74_v20 = vperm.slane %v67_v14, %v70_v16 }
  0x91   :  { %v105_v23 = vperm.slane %v101_v18, %v70_v16 }
  0x94   :  { %v66_v17 = vpop.xlane.xlu0 %65 }
  0x95   :  { %v68_v19 = vmul.f32 0.00390625, %v66_v17 }
  0x97   :  { %v75_v21 = vperm.slane %v68_v19, %v70_v16  ;;  %v102_v22 = vmul.f32 %v100_v15, %v68_v19 }
  0x99   :  { %v106_v24 = vperm.slane %v102_v22, %v70_v16  ;;  %v77_v25 = vsel %vm76_vm1, %v75_v21, %v74_v20 }
  0x9a   :  { %80 = vrot.lane.b32.xlu1 %v77_v25, %s271_s1 }
  0x9b   :  { %v107_v26 = vsel %vm76_vm1, %v106_v24, %v105_v23 }
 0x10c   :  { %v81_v27 = vpop.permute.xlu1 %80 }
 0x10d   :  { %v82_v28 = vsel %vm79_vm2, %v81_v27, %v77_v25 }
 0x10e   :  { %83 = vrot.lane.b32.xlu1 %v82_v28, %s271_s1 }
 0x180   :  { %v84_v29 = vpop.permute.xlu1 %83 }
 0x181   :  { %v85_v30 = vsel %vm79_vm2, %v84_v29, %v77_v25 }
 0x182   :  { %87 = vrot.lane.b32.xlu2 %v85_v30, %s272_s20 }
 0x18a   :  { %92 = vrot.lane.b32.xlu2 %v85_v30, %s273_s21 }
 0x1dc   :  { %v88_v32 = vpop.permute.xlu2 %87 }
 0x1dd   :  { %v90_v34 = vsel %vm71_vm3, %v88_v32, 0.0 }
 0x1de   :  { %v98_v35 = vmul.f32 %v97_v33, %v90_v34 }
 0x1e0   :  { %v109_v39 = vadd.f32 %v107_v26, %v98_v35 }
 0x1e4   :  { %v93_v37 = vpop.permute.xlu2 %92 }
 0x1e5   :  { %v95_v38 = vsel %vm91_vm4, %v93_v37, 0.0 }
 0x1e6   :  { %v112_v40 = vmul.f32 %v111_v36, %v95_v38 }
 0x1e8   :  { %v113_v41 = vadd.f32 %v112_v40, %v109_v39 }
 0x1ea   :  { %v185_v42 = vmul.f32 -1.442695, %v113_v41 }
 0x1ec   :  { %197 = vpow2.f32 %v185_v42 }
 0x1f2   :  { %v198_v43 = vpop.eup %197 }
 0x1f3   :  { %v117_v44 = vadd.f32 1.0, %v198_v43 }
 0x1f5   :  { %199 = vrcp.f32 %v117_v44  ;;  %v129_v48 = vand.u32 2147483648, %v117_v44  ;;  %v127_v50 = vand.u32 2147483647, %v117_v44  ;;  %vm123_vm6 = vweird.f32 %v117_v44 }
 0x1f7   :  { %v130_v52 = vor.u32 1.1754944e-38, %v129_v48  ;;  %vm128_vm8 = vcmp.eq.f32.partialorder %v127_v50, 8.507059e+37 }
 0x1fb   :  { %v200_v45 = vpop.eup %199 }
 0x1fc   :  { %v119_v46 = vmul.f32 %v200_v45, %v117_v44  ;;  %vm124_vm5 = vweird.f32 %v200_v45 }
 0x1fd   :  { %vm125_vm7 = vmor %vm123_vm6, %vm124_vm5 }
 0x1fe   :  { %v120_v47 = vsub.f32 1.0, %v119_v46 }
 0x200   :  { %v121_v49 = vmul.f32 %v200_v45, %v120_v47 }
 0x202   :  { %v122_v51 = vadd.f32 %v200_v45, %v121_v49 }
 0x204   :  { %v126_v53 = vsel %vm125_vm7, %v200_v45, %v122_v51 }
 0x205   :  { %v131_v54 = vsel %vm128_vm8, %v130_v52, %v126_v53 }
 0x206   :  { %v140_v55 = vperm.slane %v131_v54, 1  ;;  %v133_v56 = vperm.slane %v131_v54, 0 }
 0x208   :  { %145 = vperm.xlu1 %196, %v140_v55   ;;  %138 = vperm.xlu0 %195, %v133_v56  }
 0x27a   :  { %v146_v60 = vpop.permute.xlu1 %145  ;;  %v139_v61 = vpop.permute.xlu0 %138 }
 0x27b   :  { %v156_v62 = vperm.slane %v146_v60, %v151_v59  ;;  %v152_v63 = vperm.slane %v139_v61, %v151_v59 }
 0x27d   :  { %v160_v2 = vmul.f32 %v156_v62, %v302_v1  ;;  %v159_v3 = vmul.f32 %v152_v63, %v300_v0 }
 0x27f   :  { %162 = vst [vmem:[#allocation7 + $0x8] sm:$0xff] %v160_v2 }
 0x280   :  { %161 = vst [vmem:[#allocation7] sm:$0xff] %v159_v3 }
 0x281   :  { %175 = dma.vmem_to_hbm [thread:$0]  %s168_s25, 256, %s170_s28, [#allocation4], %s269_s18, %s269_s18, %s270_s19  }
 0x282   :  { %265 = dma.done.wait [#allocation4], 256  }
 0x283   :  { %266 = vsyncadd [#allocation4], 4294967040 }
 0x284   :  { %180 = vsyncpa [#allocation3], 1 }
 0x285   :  { %181 = vsyncpa [#allocation4], 1 }
 0x286   :  { %182 = vsyncpa [#allocation5], 1 }

</bundles_post_ra>
